<compile_context>
chip_gen: v6e
topology: v6e:2x2x1
jax: 0.10.0
libtpu: 0.0.40
codegen_flags: <defaults>
</compile_context>

<pallas_src>
import math

import jax
import jax.numpy as jnp
from jax.experimental import pallas as pl
from jax.experimental.pallas import tpu as pltpu


def _round_up(x, m):
    return ((x + m - 1) // m) * m


# ---------------------------------------------------------------------------
# Fused Pallas kernel:  (M,K)@(K,N)  ->  +c1 -> ReLU -> *s2 + c2 -> ReLU
# (BN1 scale pre-folded into B; BN2 scale/bias pre-repeated per conv channel.)
# ---------------------------------------------------------------------------

def _matmul_epilogue_kernel(a_ref, b_ref, v_ref, o_ref):
    # bf16 operands on the MXU, f32 accumulation; f32 epilogue (v5e-safe).
    acc = jnp.dot(a_ref[...], b_ref[...], preferred_element_type=jnp.float32)
    y = jnp.maximum(acc + v_ref[0:1, :], 0.0)                  # BN1 bias + ReLU1
    y = jnp.maximum(y * v_ref[1:2, :] + v_ref[2:3, :], 0.0)    # BN2 (repeated) + ReLU2
    o_ref[...] = y.astype(o_ref.dtype)                         # bf16 writeback


def _vmem_bytes(tm, K, N):
    # Explicit budget (review item): A + resident B + packed vectors + output,
    # counting double-buffering conservatively.
    return (2 * tm * K * 2        # bf16 A tiles, double-buffered
            + 2 * K * N * 2       # bf16 B, resident (counted x2 to be safe)
            + 2 * 3 * N * 4       # packed f32 epilogue vectors
            + 2 * tm * N * 2)     # bf16 output tiles, double-buffered


def _select_tm(M, K, N, vmem_budget=12 << 20):
    """tm <= 512, multiple of 16 (bf16 sublane packing); guarantee >= 2 i-tiles
    when M allows so both v7x TensorCores get work; shrink under a VMEM budget
    that also fits v5e's 16 MiB default scoped limit and v7x's 64 MiB physical."""
    m16 = _round_up(M, 16)
    if m16 > 512:
        tm = 512
    elif m16 > 16:
        tm = max(16, _round_up((m16 + 1) // 2, 16))   # split into 2 i-tiles
    else:
        tm = 16
    while tm > 16 and _vmem_bytes(tm, K, N) > vmem_budget:
        tm = max(16, _round_up(tm // 2, 16))
    return tm


def fused_conv_epilogue_matmul(a, b, vecs):
    """relu( relu(a @ b + c1) * s2 + c2 )  with a:(M,K) bf16, b:(K,N) bf16,
    vecs:(3,N) f32 rows = (c1, s2, c2).  Returns bf16 (M,N)."""
    M, K = a.shape
    Kb, N = b.shape
    assert K == Kb and vecs.shape == (3, N)

    tm = _select_tm(M, K, N)
    M_pad = _round_up(M, tm)
    if M_pad != M:
        a = jnp.pad(a, ((0, M_pad - M), (0, 0)))

    need = _vmem_bytes(tm, K, N)
    grid = (M_pad // tm,)

    out = pl.pallas_call(
        _matmul_epilogue_kernel,
        out_shape=jax.ShapeDtypeStruct((M_pad, N), jnp.bfloat16),
        grid_spec=pltpu.PrefetchScalarGridSpec(
            num_scalar_prefetch=0,
            grid=grid,
            in_specs=[
                pl.BlockSpec((tm, K), lambda i: (i, 0)),
                pl.BlockSpec((K, N), lambda i: (0, 0)),   # VMEM-resident weights
                pl.BlockSpec((3, N), lambda i: (0, 0)),   # packed c1 / s2 / c2
            ],
            out_specs=pl.BlockSpec((tm, N), lambda i: (i, 0)),
        ),
        compiler_params=pltpu.CompilerParams(
            dimension_semantics=("parallel",),
            vmem_limit_bytes=min(max(2 * need, 16 << 20), 48 << 20)),
    )(a, b, vecs)
    return out[:M] if M_pad != M else out


# ---------------------------------------------------------------------------
# XLA glue (fused under the single jit): bf16 im2col, reference pixel shuffle
# ---------------------------------------------------------------------------

def _im2col_3x3_p1_bf16(x, k_pad):
    """NHWC, 3x3 conv, stride 1, padding 1 -> (N*H*W, k_pad) bf16 patches in
    (ki, kj, cin) order.  Cast to bf16 BEFORE materializing (half the traffic)."""
    N, H, W, C = x.shape
    xp = jnp.pad(x.astype(jnp.bfloat16), ((0, 0), (1, 1), (1, 1), (0, 0)))
    cols = [xp[:, ki:ki + H, kj:kj + W, :] for ki in range(3) for kj in range(3)]
    a = jnp.concatenate(cols, axis=-1).reshape(N * H * W, 9 * C)
    if k_pad > 9 * C:
        a = jnp.pad(a, ((0, 0), (0, k_pad - 9 * C)))
    return a


def _pixel_shuffle_nhwc(x, r):
    """NHWC pixel shuffle matching torch.nn.PixelShuffle (reference path only)."""
    N, H, W, C = x.shape
    cout = C // (r * r)
    x = x.reshape(N, H, W, cout, r, r)
    x = jnp.transpose(x, (0, 1, 4, 2, 5, 3))
    return x.reshape(N, H * r, W * r, cout)


# ---------------------------------------------------------------------------
# DecoderBlock forward (single jit).  Output is bf16 NCHW.
# ---------------------------------------------------------------------------

@jax.jit
def decoder_block_forward(x_nchw, params):
    """DecoderBlock(upsample_mode='pixelshuffle', BN_enable=True) forward."""
    x = jnp.transpose(x_nchw, (0, 2, 3, 1))                     # NCHW -> NHWC
    N, H, W, _ = x.shape
    mid = params["w_mat"].shape[1]
    out_ch = mid // 4

    a = _im2col_3x3_p1_bf16(x, params["w_mat"].shape[0])        # (N*H*W, K_pad) bf16
    y = fused_conv_epilogue_matmul(a, params["w_mat"], params["vecs"])  # bf16

    # PixelShuffle(2) + NHWC->NCHW composed into ONE permutation:
    # out[n, co, 2h+r1, 2w+r2] = y[n, h, w, co, r1, r2]
    y = y.reshape(N, H, W, out_ch, 2, 2)
    y = jnp.transpose(y, (0, 3, 1, 4, 2, 5))
    return y.reshape(N, out_ch, 2 * H, 2 * W)


# ---------------------------------------------------------------------------
# Deterministic parameter construction (synthetic, no checkpoint)
# ---------------------------------------------------------------------------

def make_decoder_params(key, in_ch, mid_ch, out_ch, eps=1e-5):
    assert mid_ch == out_ch * 4, "pixelshuffle(2) requires mid = 4 * out"
    ks = jax.random.split(key, 9)
    w = (jax.random.normal(ks[0], (mid_ch, in_ch, 3, 3), jnp.float32)
         * math.sqrt(2.0 / (in_ch * 9)))

    def bn(kg, kb, km, kv, c):
        gamma = 1.0 + 0.1 * jax.random.normal(kg, (c,), jnp.float32)
        beta = 0.1 * jax.random.normal(kb, (c,), jnp.float32)
        mean = 0.1 * jax.random.normal(km, (c,), jnp.float32)
        var = 1.0 + 0.1 * jax.random.uniform(kv, (c,), jnp.float32)
        scale = gamma / jnp.sqrt(var + eps)
        bias = beta - mean * scale
        return (gamma, beta, mean, var), scale, bias

    raw_bn1, s1, c1 = bn(ks[1], ks[2], ks[3], ks[4], mid_ch)
    raw_bn2, s2, c2 = bn(ks[5], ks[6], ks[7], ks[8], out_ch)

    k = 9 * in_ch
    k_pad = _round_up(k, 128)
    # (KH*KW*Cin, Cout) weight matrix with BN1's scale folded in (multiply in
    # f32, single bf16 cast), zero-padded along K to the MXU-aligned width.
    w_mat = jnp.transpose(w, (2, 3, 1, 0)).reshape(k, mid_ch) * s1[None, :]
    w_mat = jnp.pad(w_mat, ((0, k_pad - k), (0, 0))).astype(jnp.bfloat16)

    # BN2 runs after PixelShuffle(2); conv channel c maps to shuffled channel
    # c // 4, so repeating its scale/bias 4x lets it fuse into the conv epilogue.
    vecs = jnp.stack([c1, jnp.repeat(s2, 4), jnp.repeat(c2, 4)]).astype(jnp.float32)

    params = {"w_mat": w_mat, "vecs": vecs}
    raw = {"w": w, "bn1": raw_bn1, "bn2": raw_bn2, "eps": eps}
    return params, raw


# ---------------------------------------------------------------------------
# Pure-JAX reference (f32, un-fused) for a correctness check
# ---------------------------------------------------------------------------

def reference_forward(x_nchw, raw):
    eps = raw["eps"]
    x = jnp.transpose(x_nchw, (0, 2, 3, 1))
    w_hwio = jnp.transpose(raw["w"], (2, 3, 1, 0))
    y = jax.lax.conv_general_dilated(x, w_hwio, (1, 1), ((1, 1), (1, 1)),
                                     dimension_numbers=("NHWC", "HWIO", "NHWC"))
    g1, b1, m1, v1 = raw["bn1"]
    y = (y - m1) / jnp.sqrt(v1 + eps) * g1 + b1
    y = jnp.maximum(y, 0.0)
    y = _pixel_shuffle_nhwc(y, 2)
    g2, b2, m2, v2 = raw["bn2"]
    y = (y - m2) / jnp.sqrt(v2 + eps) * g2 + b2
    y = jnp.maximum(y, 0.0)
    return jnp.transpose(y, (0, 3, 1, 2))


# ---------------------------------------------------------------------------
# Main
# ---------------------------------------------------------------------------

if __name__ == "__main__":
    key = jax.random.PRNGKey(0)
    kx, kp = jax.random.split(key)

    B, Cin, H, W = 2, 16, 16, 16        # NCHW input
    mid_ch, out_ch = 64, 16             # mid = 4 * out  (PixelShuffle(2))

    x = jax.random.normal(kx, (B, Cin, H, W), jnp.float32)
    params, raw = make_decoder_params(kp, Cin, mid_ch, out_ch)

    y = decoder_block_forward(x, params)
    jax.block_until_ready(y)

    assert y.shape == (B, out_ch, 2 * H, 2 * W), y.shape
    yf = jnp.asarray(y, jnp.float32)
    assert bool(jnp.all(jnp.isfinite(yf)))

    ref = reference_forward(x, raw)
    max_err = float(jnp.max(jnp.abs(yf - ref)))
    assert max_err < 1.2e-1, f"max abs error {max_err} (bf16 kernel/output vs f32 reference)"

    print("KERNEL_OK")
</pallas_src>

<mosaic_0001>
module attributes {stable_mosaic.version = 11 : i64} {
  func.func @_matmul_epilogue_kernel(%arg0: i32, %arg1: memref<256x256xbf16, #tpu.memory_space<vmem>>, %arg2: memref<256x64xbf16, #tpu.memory_space<vmem>>, %arg3: memref<3x64xf32, #tpu.memory_space<vmem>>, %arg4: memref<256x64xbf16, #tpu.memory_space<vmem>>) attributes {dimension_semantics = [#tpu.dimension_semantics<parallel>], iteration_bounds = array<i64: 2>, scalar_prefetch = 0 : i64, scratch_operands = 0 : i64, tpu.core_type = #tpu.core_type<tc>, window_params = [{transform_indices = @transform_0, window_bounds = array<i64: 256, 256>}, {pipeline_mode = #tpu.pipeline_mode<synchronous>, transform_indices = @transform_1, window_bounds = array<i64: 256, 64>}, {pipeline_mode = #tpu.pipeline_mode<synchronous>, transform_indices = @transform_2, window_bounds = array<i64: 3, 64>}, {transform_indices = @transform_3, window_bounds = array<i64: 256, 64>}]} {
    %c0 = arith.constant 0 : index
    %c0_0 = arith.constant 0 : index
    %0 = vector.load %arg1[%c0, %c0_0] : memref<256x256xbf16, #tpu.memory_space<vmem>>, vector<256x256xbf16>
    %c0_1 = arith.constant 0 : index
    %c0_2 = arith.constant 0 : index
    %1 = vector.load %arg2[%c0_1, %c0_2] : memref<256x64xbf16, #tpu.memory_space<vmem>>, vector<256x64xbf16>
    %cst = arith.constant dense<0.000000e+00> : vector<256x64xf32>
    %2 = tpu.matmul %0, %1, %cst {dimension_numbers = #tpu.dot_dimension_numbers<[1], [0], [0], [1], [0, 0, 1, 1], [], []>} : vector<256x256xbf16>, vector<256x64xbf16>, vector<256x64xf32> -> vector<256x64xf32>
    %c0_3 = arith.constant 0 : index
    %c0_4 = arith.constant 0 : index
    %3 = vector.load %arg3[%c0_3, %c0_4] : memref<3x64xf32, #tpu.memory_space<vmem>>, vector<1x64xf32>
    %4 = vector.broadcast %3 : vector<1x64xf32> to vector<256x64xf32>
    %5 = arith.addf %2, %4 : vector<256x64xf32>
    %cst_5 = arith.constant 0.000000e+00 : f32
    %6 = vector.broadcast %cst_5 : f32 to vector<256x64xf32>
    %7 = arith.maximumf %5, %6 : vector<256x64xf32>
    %c1 = arith.constant 1 : index
    %c0_6 = arith.constant 0 : index
    %8 = vector.load %arg3[%c1, %c0_6] : memref<3x64xf32, #tpu.memory_space<vmem>>, vector<1x64xf32>
    %9 = vector.broadcast %8 : vector<1x64xf32> to vector<256x64xf32>
    %10 = arith.mulf %7, %9 : vector<256x64xf32>
    %c2 = arith.constant 2 : index
    %c0_7 = arith.constant 0 : index
    %11 = vector.load %arg3[%c2, %c0_7] : memref<3x64xf32, #tpu.memory_space<vmem>>, vector<1x64xf32>
    %12 = vector.broadcast %11 : vector<1x64xf32> to vector<256x64xf32>
    %13 = arith.addf %10, %12 : vector<256x64xf32>
    %cst_8 = arith.constant 0.000000e+00 : f32
    %14 = vector.broadcast %cst_8 : f32 to vector<256x64xf32>
    %15 = arith.maximumf %13, %14 : vector<256x64xf32>
    %16 = arith.truncf %15 : vector<256x64xf32> to vector<256x64xbf16>
    %c0_9 = arith.constant 0 : index
    %c0_10 = arith.constant 0 : index
    %17 = vector.load %arg4[%c0_9, %c0_10] : memref<256x64xbf16, #tpu.memory_space<vmem>>, vector<256x64xbf16>
    tpu.vector_store %arg4[%c0_9, %c0_10], %16 {strides = array<i32>} : memref<256x64xbf16, #tpu.memory_space<vmem>>, vector<256x64xbf16>,
    return
  }
  func.func @transform_0(%arg0: i32) -> (i32, i32) {
    %c0_i32 = arith.constant 0 : i32
    %c0_i32_0 = arith.constant 0 : i32
    return %arg0, %c0_i32 : i32, i32
  }
  func.func @transform_1(%arg0: i32) -> (i32, i32) {
    %c0_i32 = arith.constant 0 : i32
    %c0_i32_0 = arith.constant 0 : i32
    %c0_i32_1 = arith.constant 0 : i32
    return %c0_i32, %c0_i32_0 : i32, i32
  }
  func.func @transform_2(%arg0: i32) -> (i32, i32) {
    %c0_i32 = arith.constant 0 : i32
    %c0_i32_0 = arith.constant 0 : i32
    %c0_i32_1 = arith.constant 0 : i32
    return %c0_i32, %c0_i32_0 : i32, i32
  }
  func.func @transform_3(%arg0: i32) -> (i32, i32) {
    %c0_i32 = arith.constant 0 : i32
    %c0_i32_0 = arith.constant 0 : i32
    return %arg0, %c0_i32 : i32, i32
  }
}

</mosaic_0001>

<bundles_post_ra>
// kernel: decoder_block_forward.1
= control target key start
LH: loop header
LB: loop body
LE: loop exit
PB: predicated region body
PF: predicated region fallthrough
CT: control target
= control target key end

     0   :  { %s1375_s12 = smov 0   ;;  %s1655_s0 = inlined_call_operand.vmem [shape: bf16[512,256], index: 0, kind: input, shape index: {}]   ;;  %s1656_s1 = inlined_call_operand.vmem [shape: bf16[256,64], index: 1, kind: input, shape index: {}]   ;;  %s1657_s2 = inlined_call_operand.vmem [shape: f32[3,64], index: 2, kind: input, shape index: {}]   ;;  %s1658_s3 = inlined_call_operand.vmem [shape: bf16[512,64], index: 3, kind: output, shape index: {}]  }
   0x1 LB: > { %s1019_s13 = sadd.s32 4294967295, %s1353_s12   ;;  %p1023_p0 = scmp.ge.s32.totalorder %s1353_s12, 1  ;;  %s1353_s12 = sphi %s1375_s12, %s13_s12  }
   0x2   : > { %p139_p1 = scmp.lt.s32.totalorder %s1353_s12, 3 }
   0x4   : > { %p140_p2 = pnand %p1023_p0, %p139_p1 }
   0x5   : > { %s1024_s16 = sshll.u32 (!%p140_p2), %s1019_s13, 5 }
   0x6   : > { %143 = sbr.rel (%p140_p2) target bundleno = 315 (0x13b), region = 32  ;;  %p165_p3 = scmp.lt.s32.totalorder (!%p140_p2), %s1024_s16, 63 }
   0xb   : > { %v1283_v0 = vld [vmem:[%s1656_s1 + $0x78] sm:$0xff]   ;;  %v1285_v2 = vld [vmem:[%s1656_s1 + $0x70] sm:$0xff]   ;;  %v1287_v4 = vld [vmem:[%s1656_s1 + $0x68] sm:$0xff]   ;;  %s1660_s16 = smov (!%p165_p3, %s1024_s16), 63  ;;  %vm930_vm0 = vcmask 519168  }
   0xc   : > { %v1284_v1 = vld [vmem:[%s1656_s1 + $0x38] sm:$0xff]   ;;  %1147 = vmatprep.subr.bf16.mxu0 %v1283_v0  ;;  %1259 = vmatprep.subr.bf16.mxu1 %v1283_v0  ;;  %v1286_v3 = vld [vmem:[%s1656_s1 + $0x30] sm:$0xff]   ;;  %v1288_v5 = vld [vmem:[%s1656_s1 + $0x28] sm:$0xff]   ;;  %s1114_s4 = sshll.u32 %s1660_s16, 3  ;;  %s1028_s5 = sshll.u32 %s1660_s16, 2 }
   0xd   : > { %1148 = vmatpush3.bf16.msra.mxu0 %v1284_v1  ;;  %1267 = vmatpush3.bf16.msra.mxu1 %v1284_v1  ;;  %v1289_v6 = vld [vmem:[%s1656_s1 + $0x60] sm:$0xff]   ;;  %v1291_v8 = vld [vmem:[%s1656_s1 + $0x58] sm:$0xff]   ;;  %s1416_s9 = scalar_lea.vmem %s1655_s0, %s1114_s4  ;;  %v1293_v10 = vld [vmem:[%s1656_s1 + $0x50] sm:$0xff]   ;;  %s1500_s16 = scalar_lea.vmem %s1658_s3, %s1028_s5 }
   0xe   : > { %1149 = vmatprep.subr.bf16.mxu0 %v1285_v2  ;;  %1260 = vmatprep.subr.bf16.mxu1 %v1285_v2  ;;  %v1290_v7 = vld [vmem:[%s1656_s1 + $0x20] sm:$0xff]   ;;  %v1292_v9 = vld [vmem:[%s1656_s1 + $0x18] sm:$0xff]   ;;  %v1294_v13 = vld [vmem:[%s1656_s1 + $0x10] sm:$0xff]  }
   0xf   : > { %v1301_v11 = vld [vmem:[%s1416_s9 + $0x4] ss:$8 sps:$4 sm:$0xff]   ;;  %v1299_v18 = vld [vmem:[%s1416_s9] ss:$8 sps:$4 sm:$0xff]   ;;  %v1305_v20 = vld [vmem:[%s1416_s9 + $0x14] ss:$8 sps:$4 sm:$0xff]  }
  0x10   : > { %v1304_v12 = vld [vmem:[%s1416_s9 + $0x84] ss:$8 sps:$4 sm:$0xff]   ;;  %535 = vmatprep.mubr.bf16.mxu0 %v1301_v11  ;;  %v1302_v19 = vld [vmem:[%s1416_s9 + $0x80] ss:$8 sps:$4 sm:$0xff]   ;;  %v1307_v21 = vld [vmem:[%s1416_s9 + $0x94] ss:$8 sps:$4 sm:$0xff]  }
  0x11   : > { %1150 = vmatpush3.bf16.msra.mxu0 %v1286_v3  ;;  %1268 = vmatpush3.bf16.msra.mxu1 %v1286_v3  ;;  %v1295_v14 = vld [vmem:[%s1656_s1 + $0x48] sm:$0xff]   ;;  %v1297_v16 = vld [vmem:[%s1656_s1 + $0x40] sm:$0xff]   ;;  %v1309_v22 = vld [vmem:[%s1416_s9 + $0x10] ss:$8 sps:$4 sm:$0xff]  }
  0x12   : > { %1151 = vmatprep.subr.bf16.mxu0 %v1287_v4  ;;  %1261 = vmatprep.subr.bf16.mxu1 %v1287_v4  ;;  %v1296_v15 = vld [vmem:[%s1656_s1 + $0x8] sm:$0xff]   ;;  %v1298_v17 = vld [vmem:[%s1656_s1] sm:$0xff]   ;;  %v1310_v23 = vld [vmem:[%s1416_s9 + $0x90] ss:$8 sps:$4 sm:$0xff]  }
  0x13   : > { %599 = vmatprep.mubr.bf16.mxu1 %v1304_v12  ;;  %v1311_v24 = vld [vmem:[%s1416_s9 + $0x24] ss:$8 sps:$4 sm:$0xff]   ;;  %v1315_v26 = vld [vmem:[%s1416_s9 + $0x20] ss:$8 sps:$4 sm:$0xff]   ;;  %v1317_v28 = vld [vmem:[%s1416_s9 + $0x34] ss:$8 sps:$4 sm:$0xff]  }
  0x14   : > { %v1313_v25 = vld [vmem:[%s1416_s9 + $0xa4] ss:$8 sps:$4 sm:$0xff]   ;;  %v1316_v27 = vld [vmem:[%s1416_s9 + $0xa0] ss:$8 sps:$4 sm:$0xff]   ;;  %v1319_v29 = vld [vmem:[%s1416_s9 + $0xb4] ss:$8 sps:$4 sm:$0xff]  }
  0x15   : > { %1152 = vmatpush3.bf16.msra.mxu0 %v1288_v5  ;;  %1269 = vmatpush3.bf16.msra.mxu1 %v1288_v5  ;;  %v1321_v30 = vld [vmem:[%s1416_s9 + $0x30] ss:$8 sps:$4 sm:$0xff]   ;;  %v1323_v32 = vld [vmem:[%s1416_s9 + $0x44] ss:$8 sps:$4 sm:$0xff]   ;;  %v1327_v34 = vld [vmem:[%s1416_s9 + $0x40] ss:$8 sps:$4 sm:$0xff]  }
  0x16   : > { %1153 = vmatprep.subr.bf16.mxu0 %v1289_v6  ;;  %1262 = vmatprep.subr.bf16.mxu1 %v1289_v6  ;;  %v1322_v31 = vld [vmem:[%s1416_s9 + $0xb0] ss:$8 sps:$4 sm:$0xff]   ;;  %v1325_v33 = vld [vmem:[%s1416_s9 + $0xc4] ss:$8 sps:$4 sm:$0xff]   ;;  %v1328_v35 = vld [vmem:[%s1416_s9 + $0xc0] ss:$8 sps:$4 sm:$0xff]  }
  0x17   : > { %v1329_v36 = vld [vmem:[%s1416_s9 + $0x54] ss:$8 sps:$4 sm:$0xff]   ;;  %v1333_v38 = vld [vmem:[%s1416_s9 + $0x50] ss:$8 sps:$4 sm:$0xff]   ;;  %v1335_v40 = vld [vmem:[%s1416_s9 + $0x64] ss:$8 sps:$4 sm:$0xff]  }
  0x18   : > { %v1331_v37 = vld [vmem:[%s1416_s9 + $0xd4] ss:$8 sps:$4 sm:$0xff]   ;;  %v1334_v39 = vld [vmem:[%s1416_s9 + $0xd0] ss:$8 sps:$4 sm:$0xff]   ;;  %v1337_v41 = vld [vmem:[%s1416_s9 + $0xe4] ss:$8 sps:$4 sm:$0xff]  }
  0x19   : > { %1154 = vmatpush3.bf16.msra.mxu0 %v1290_v7  ;;  %1270 = vmatpush3.bf16.msra.mxu1 %v1290_v7  ;;  %v1339_v42 = vld [vmem:[%s1416_s9 + $0x60] ss:$8 sps:$4 sm:$0xff]   ;;  %v1341_v44 = vld [vmem:[%s1416_s9 + $0x74] ss:$8 sps:$4 sm:$0xff]   ;;  %v1345_v46 = vld [vmem:[%s1416_s9 + $0x70] ss:$8 sps:$4 sm:$0xff]  }
  0x1a   : > { %1155 = vmatprep.subr.bf16.mxu0 %v1291_v8  ;;  %1263 = vmatprep.subr.bf16.mxu1 %v1291_v8  ;;  %v1340_v43 = vld [vmem:[%s1416_s9 + $0xe0] ss:$8 sps:$4 sm:$0xff]   ;;  %v1343_v45 = vld [vmem:[%s1416_s9 + $0xf4] ss:$8 sps:$4 sm:$0xff]   ;;  %v1346_v47 = vld [vmem:[%s1416_s9 + $0xf0] ss:$8 sps:$4 sm:$0xff]  }
  0x1b   : > { %v1474_v50 = vld [vmem:[%s1657_s2] ss:$0 sm:$0xff]  ;;  %v1481_v59 = vld [vmem:[%s1657_s2 + $0x1] ss:$0 sm:$0xff]  ;;  %v1486_v2 = vld [vmem:[%s1657_s2 + $0x2] ss:$0 sm:$0xff] }
  0x1d   : > { %1156 = vmatpush3.bf16.msra.mxu0 %v1292_v9  ;;  %1271 = vmatpush3.bf16.msra.mxu1 %v1292_v9 }
  0x1e   : > { %1157 = vmatprep.subr.bf16.mxu0 %v1293_v10  ;;  %1264 = vmatprep.subr.bf16.mxu1 %v1293_v10 }
  0x21   : > { %1158 = vmatpush3.bf16.msra.mxu0 %v1294_v13  ;;  %1272 = vmatpush3.bf16.msra.mxu1 %v1294_v13 }
  0x22   : > { %1159 = vmatprep.subr.bf16.mxu0 %v1295_v14  ;;  %1265 = vmatprep.subr.bf16.mxu1 %v1295_v14 }
  0x25   : > { %1160 = vmatpush3.bf16.msra.mxu0 %v1296_v15  ;;  %1273 = vmatpush3.bf16.msra.mxu1 %v1296_v15 }
  0x26   : > { %1161 = vmatprep.subr.bf16.mxu0 %v1297_v16  ;;  %1266 = vmatprep.subr.bf16.mxu1 %v1297_v16 }
  0x29   : > { %1162 = vmatpush3.bf16.msra.mxu0 %v1298_v17  ;;  %1274 = vmatpush3.bf16.msra.mxu1 %v1298_v17 }
  0x2c   : > { %536 = vmatmul.mubr.bf16.vlgmr.msra.gmra.mxu0 %v1299_v18  ;;  %600 = vmatmul.mubr.bf16.vlgmr.msra.gmra.mxu1 %v1302_v19 }
  0x2d   : > { %543 = vmatprep.mubr.bf16.mxu0 %v1305_v20  ;;  %607 = vmatprep.mubr.bf16.mxu1 %v1307_v21 }
  0x34   : > { %544 = vmatmul.mubr.bf16.gmra.mxu0 %v1309_v22  ;;  %608 = vmatmul.mubr.bf16.gmra.mxu1 %v1310_v23 }
  0x35   : > { %551 = vmatprep.mubr.bf16.mxu0 %v1311_v24  ;;  %615 = vmatprep.mubr.bf16.mxu1 %v1313_v25 }
  0x3c   : > { %552 = vmatmul.mubr.bf16.gmra.mxu0 %v1315_v26  ;;  %616 = vmatmul.mubr.bf16.gmra.mxu1 %v1316_v27 }
  0x3d   : > { %559 = vmatprep.mubr.bf16.mxu0 %v1317_v28  ;;  %623 = vmatprep.mubr.bf16.mxu1 %v1319_v29 }
  0x44   : > { %560 = vmatmul.mubr.bf16.gmra.mxu0 %v1321_v30  ;;  %624 = vmatmul.mubr.bf16.gmra.mxu1 %v1322_v31 }
  0x45   : > { %567 = vmatprep.mubr.bf16.mxu0 %v1323_v32  ;;  %631 = vmatprep.mubr.bf16.mxu1 %v1325_v33 }
  0x4c   : > { %568 = vmatmul.mubr.bf16.gmra.mxu0 %v1327_v34  ;;  %632 = vmatmul.mubr.bf16.gmra.mxu1 %v1328_v35 }
  0x4d   : > { %575 = vmatprep.mubr.bf16.mxu0 %v1329_v36  ;;  %639 = vmatprep.mubr.bf16.mxu1 %v1331_v37 }
  0x54   : > { %576 = vmatmul.mubr.bf16.gmra.mxu0 %v1333_v38  ;;  %640 = vmatmul.mubr.bf16.gmra.mxu1 %v1334_v39 }
  0x55   : > { %583 = vmatprep.mubr.bf16.mxu0 %v1335_v40  ;;  %647 = vmatprep.mubr.bf16.mxu1 %v1337_v41 }
  0x5c   : > { %584 = vmatmul.mubr.bf16.gmra.mxu0 %v1339_v42  ;;  %648 = vmatmul.mubr.bf16.gmra.mxu1 %v1340_v43 }
  0x5d   : > { %591 = vmatprep.mubr.bf16.mxu0 %v1341_v44  ;;  %655 = vmatprep.mubr.bf16.mxu1 %v1343_v45 }
  0x64   : > { %592 = vmatmul.mubr.bf16.gmra.mxu0 %v1345_v46  ;;  %656 = vmatmul.mubr.bf16.gmra.mxu1 %v1346_v47 }
  0xec   : > { %v1163_v48 = vpop.f32.mrf.mxu0  ;;  %v1211_v49 = vpop.f32.mrf.mxu1 }
  0xee   : > { %v1164_v51 = vpop.f32.mrf.mxu0  ;;  %v1212_v52 = vpop.f32.mrf.mxu1 }
  0xef   : > { %v1165_v53 = vadd.f32 %v1164_v51, %v1163_v48  ;;  %v1213_v54 = vadd.f32 %v1212_v52, %v1211_v49 }
  0xf0   : > { %v1166_v55 = vpop.f32.mrf.mxu0  ;;  %v1214_v56 = vpop.f32.mrf.mxu1 }
  0xf1   : > { %v538_v57 = vadd.f32 %v1165_v53, %v1474_v50  ;;  %v602_v58 = vadd.f32 %v1213_v54, %v1474_v50 }
  0xf2   : > { %v1167_v60 = vpop.f32.mrf.mxu0  ;;  %v1215_v61 = vpop.f32.mrf.mxu1 }
  0xf3   : > { %v664_v62 = vmax.f32 %v538_v57, 0.0  ;;  %v680_v63 = vmax.f32 %v602_v58, 0.0  ;;  %v1168_v0 = vadd.f32 %v1167_v60, %v1166_v55  ;;  %v1216_v1 = vadd.f32 %v1215_v61, %v1214_v56 }
  0xf4   : > { %v1169_v3 = vpop.f32.mrf.mxu0  ;;  %v1217_v4 = vpop.f32.mrf.mxu1 }
  0xf5   : > { %v701_v5 = vmul.f32 %v1481_v59, %v664_v62  ;;  %v717_v6 = vmul.f32 %v1481_v59, %v680_v63  ;;  %v541_v7 = vadd.f32 %v1168_v0, %v1474_v50  ;;  %v605_v8 = vadd.f32 %v1216_v1, %v1474_v50 }
  0xf6   : > { %v1170_v9 = vpop.f32.mrf.mxu0  ;;  %v1218_v10 = vpop.f32.mrf.mxu1 }
  0xf7   : > { %v738_v11 = vadd.f32 %v1486_v2, %v701_v5  ;;  %v754_v12 = vadd.f32 %v1486_v2, %v717_v6  ;;  %v665_v13 = vmax.f32 %v541_v7, 0.0  ;;  %v681_v14 = vmax.f32 %v605_v8, 0.0 }
  0xf8   : > { %v1171_v15 = vadd.f32 %v1170_v9, %v1169_v3  ;;  %v1219_v16 = vadd.f32 %v1218_v10, %v1217_v4  ;;  %v1172_v17 = vpop.f32.mrf.mxu0  ;;  %v1220_v18 = vpop.f32.mrf.mxu1 }
  0xf9   : > { %v770_v19 = vmax.f32 %v738_v11, 0.0  ;;  %v786_v20 = vmax.f32 %v754_v12, 0.0  ;;  %v702_v21 = vmul.f32 %v1481_v59, %v665_v13  ;;  %v718_v22 = vmul.f32 %v1481_v59, %v681_v14 }
  0xfa   : > { %v546_v23 = vadd.f32 %v1171_v15, %v1474_v50  ;;  %v610_v24 = vadd.f32 %v1219_v16, %v1474_v50  ;;  %v1173_v25 = vpop.f32.mrf.mxu0  ;;  %v1221_v26 = vpop.f32.mrf.mxu1 }
  0xfb   : > { %v1115_v27 = vpack.c.bf16 %v770_v19, %v770_v19  ;;  %v1131_v28 = vpack.c.bf16 %v786_v20, %v786_v20  ;;  %v739_v29 = vadd.f32 %v1486_v2, %v702_v21  ;;  %v755_v30 = vadd.f32 %v1486_v2, %v718_v22 }
  0xfc   : > { %v666_v31 = vmax.f32 %v546_v23, 0.0  ;;  %v682_v32 = vmax.f32 %v610_v24, 0.0  ;;  %v1174_v33 = vadd.f32 %v1173_v25, %v1172_v17  ;;  %v1222_v34 = vadd.f32 %v1221_v26, %v1220_v18  ;;  %v1175_v35 = vpop.f32.mrf.mxu0  ;;  %v1223_v36 = vpop.f32.mrf.mxu1 }
  0xfd   : > { %931 = vst.msk [vmem:[%s1500_s16] sm:$0xf] %vm930_vm0, %v1115_v27  ;;  %947 = vst.msk [vmem:[%s1500_s16 + $0x40] sm:$0xf] %vm930_vm0, %v1131_v28  ;;  %v771_v37 = vmax.f32 %v739_v29, 0.0  ;;  %v787_v38 = vmax.f32 %v755_v30, 0.0 }
  0xfe   : > { %v703_v39 = vmul.f32 %v1481_v59, %v666_v31  ;;  %v719_v40 = vmul.f32 %v1481_v59, %v682_v32  ;;  %v549_v41 = vadd.f32 %v1174_v33, %v1474_v50  ;;  %v613_v42 = vadd.f32 %v1222_v34, %v1474_v50  ;;  %v1176_v43 = vpop.f32.mrf.mxu0  ;;  %v1224_v44 = vpop.f32.mrf.mxu1 }
  0xff   : > { %v1116_v45 = vpack.c.bf16 %v771_v37, %v771_v37  ;;  %v1132_v46 = vpack.c.bf16 %v787_v38, %v787_v38  ;;  %v1177_v47 = vadd.f32 %v1176_v43, %v1175_v35  ;;  %v1225_v48 = vadd.f32 %v1224_v44, %v1223_v36 }
 0x100   : > { %v740_v49 = vadd.f32 %v1486_v2, %v703_v39  ;;  %v756_v51 = vadd.f32 %v1486_v2, %v719_v40  ;;  %v667_v52 = vmax.f32 %v549_v41, 0.0  ;;  %v683_v53 = vmax.f32 %v613_v42, 0.0  ;;  %v1178_v54 = vpop.f32.mrf.mxu0  ;;  %v1226_v55 = vpop.f32.mrf.mxu1 }
 0x101   : > { %932 = vst.msk [vmem:[%s1500_s16 + $0x4] sm:$0xf] %vm930_vm0, %v1116_v45  ;;  %948 = vst.msk [vmem:[%s1500_s16 + $0x44] sm:$0xf] %vm930_vm0, %v1132_v46  ;;  %v554_v56 = vadd.f32 %v1177_v47, %v1474_v50  ;;  %v618_v57 = vadd.f32 %v1225_v48, %v1474_v50 }
 0x102   : > { %v772_v58 = vmax.f32 %v740_v49, 0.0  ;;  %v788_v60 = vmax.f32 %v756_v51, 0.0  ;;  %v704_v61 = vmul.f32 %v1481_v59, %v667_v52  ;;  %v720_v62 = vmul.f32 %v1481_v59, %v683_v53  ;;  %v1179_v63 = vpop.f32.mrf.mxu0  ;;  %v1227_v0 = vpop.f32.mrf.mxu1 }
 0x103   : > { %v668_v1 = vmax.f32 %v554_v56, 0.0  ;;  %v684_v3 = vmax.f32 %v618_v57, 0.0  ;;  %v1180_v4 = vadd.f32 %v1179_v63, %v1178_v54  ;;  %v1228_v5 = vadd.f32 %v1227_v0, %v1226_v55 }
 0x104   : > { %v1117_v6 = vpack.c.bf16 %v772_v58, %v772_v58  ;;  %v1133_v7 = vpack.c.bf16 %v788_v60, %v788_v60  ;;  %v741_v8 = vadd.f32 %v1486_v2, %v704_v61  ;;  %v757_v9 = vadd.f32 %v1486_v2, %v720_v62  ;;  %v1181_v10 = vpop.f32.mrf.mxu0  ;;  %v1229_v11 = vpop.f32.mrf.mxu1 }
 0x105   : > { %v705_v12 = vmul.f32 %v1481_v59, %v668_v1  ;;  %v721_v13 = vmul.f32 %v1481_v59, %v684_v3  ;;  %v557_v14 = vadd.f32 %v1180_v4, %v1474_v50  ;;  %v621_v15 = vadd.f32 %v1228_v5, %v1474_v50 }
 0x106   : > { %933 = vst.msk [vmem:[%s1500_s16 + $0x8] sm:$0xf] %vm930_vm0, %v1117_v6  ;;  %949 = vst.msk [vmem:[%s1500_s16 + $0x48] sm:$0xf] %vm930_vm0, %v1133_v7  ;;  %v773_v16 = vmax.f32 %v741_v8, 0.0  ;;  %v789_v17 = vmax.f32 %v757_v9, 0.0  ;;  %v1182_v18 = vpop.f32.mrf.mxu0  ;;  %v1230_v19 = vpop.f32.mrf.mxu1 }
 0x107   : > { %v742_v20 = vadd.f32 %v1486_v2, %v705_v12  ;;  %v758_v21 = vadd.f32 %v1486_v2, %v721_v13  ;;  %v669_v22 = vmax.f32 %v557_v14, 0.0  ;;  %v685_v23 = vmax.f32 %v621_v15, 0.0 }
 0x108   : > { %v1118_v24 = vpack.c.bf16 %v773_v16, %v773_v16  ;;  %v1134_v25 = vpack.c.bf16 %v789_v17, %v789_v17  ;;  %v1183_v26 = vadd.f32 %v1182_v18, %v1181_v10  ;;  %v1231_v27 = vadd.f32 %v1230_v19, %v1229_v11  ;;  %v1184_v28 = vpop.f32.mrf.mxu0  ;;  %v1232_v29 = vpop.f32.mrf.mxu1 }
 0x109   : > { %v774_v30 = vmax.f32 %v742_v20, 0.0  ;;  %v790_v31 = vmax.f32 %v758_v21, 0.0  ;;  %v706_v32 = vmul.f32 %v1481_v59, %v669_v22  ;;  %v722_v33 = vmul.f32 %v1481_v59, %v685_v23 }
 0x10a   : > { %934 = vst.msk [vmem:[%s1500_s16 + $0xc] sm:$0xf] %vm930_vm0, %v1118_v24  ;;  %950 = vst.msk [vmem:[%s1500_s16 + $0x4c] sm:$0xf] %vm930_vm0, %v1134_v25  ;;  %v562_v34 = vadd.f32 %v1183_v26, %v1474_v50  ;;  %v626_v35 = vadd.f32 %v1231_v27, %v1474_v50  ;;  %v1185_v36 = vpop.f32.mrf.mxu0  ;;  %v1233_v37 = vpop.f32.mrf.mxu1 }
 0x10b   : > { %v1119_v38 = vpack.c.bf16 %v774_v30, %v774_v30  ;;  %v1135_v39 = vpack.c.bf16 %v790_v31, %v790_v31  ;;  %v743_v40 = vadd.f32 %v1486_v2, %v706_v32  ;;  %v759_v41 = vadd.f32 %v1486_v2, %v722_v33 }
 0x10c   : > { %v670_v42 = vmax.f32 %v562_v34, 0.0  ;;  %v686_v43 = vmax.f32 %v626_v35, 0.0  ;;  %v1186_v44 = vadd.f32 %v1185_v36, %v1184_v28  ;;  %v1234_v45 = vadd.f32 %v1233_v37, %v1232_v29  ;;  %v1187_v46 = vpop.f32.mrf.mxu0  ;;  %v1235_v47 = vpop.f32.mrf.mxu1 }
 0x10d   : > { %935 = vst.msk [vmem:[%s1500_s16 + $0x10] sm:$0xf] %vm930_vm0, %v1119_v38  ;;  %951 = vst.msk [vmem:[%s1500_s16 + $0x50] sm:$0xf] %vm930_vm0, %v1135_v39  ;;  %v775_v48 = vmax.f32 %v743_v40, 0.0  ;;  %v791_v49 = vmax.f32 %v759_v41, 0.0 }
 0x10e   : > { %v707_v51 = vmul.f32 %v1481_v59, %v670_v42  ;;  %v723_v52 = vmul.f32 %v1481_v59, %v686_v43  ;;  %v565_v53 = vadd.f32 %v1186_v44, %v1474_v50  ;;  %v629_v54 = vadd.f32 %v1234_v45, %v1474_v50  ;;  %v1188_v55 = vpop.f32.mrf.mxu0  ;;  %v1236_v56 = vpop.f32.mrf.mxu1 }
 0x10f   : > { %v1120_v57 = vpack.c.bf16 %v775_v48, %v775_v48  ;;  %v1136_v58 = vpack.c.bf16 %v791_v49, %v791_v49  ;;  %v1189_v60 = vadd.f32 %v1188_v55, %v1187_v46  ;;  %v1237_v61 = vadd.f32 %v1236_v56, %v1235_v47 }
 0x110   : > { %v744_v62 = vadd.f32 %v1486_v2, %v707_v51  ;;  %v760_v63 = vadd.f32 %v1486_v2, %v723_v52  ;;  %v671_v0 = vmax.f32 %v565_v53, 0.0  ;;  %v687_v1 = vmax.f32 %v629_v54, 0.0  ;;  %v1190_v3 = vpop.f32.mrf.mxu0  ;;  %v1238_v4 = vpop.f32.mrf.mxu1 }
 0x111   : > { %936 = vst.msk [vmem:[%s1500_s16 + $0x14] sm:$0xf] %vm930_vm0, %v1120_v57  ;;  %952 = vst.msk [vmem:[%s1500_s16 + $0x54] sm:$0xf] %vm930_vm0, %v1136_v58  ;;  %v570_v5 = vadd.f32 %v1189_v60, %v1474_v50  ;;  %v634_v6 = vadd.f32 %v1237_v61, %v1474_v50 }
 0x112   : > { %v776_v7 = vmax.f32 %v744_v62, 0.0  ;;  %v792_v8 = vmax.f32 %v760_v63, 0.0  ;;  %v708_v9 = vmul.f32 %v1481_v59, %v671_v0  ;;  %v724_v10 = vmul.f32 %v1481_v59, %v687_v1  ;;  %v1191_v11 = vpop.f32.mrf.mxu0  ;;  %v1239_v12 = vpop.f32.mrf.mxu1 }
 0x113   : > { %v672_v13 = vmax.f32 %v570_v5, 0.0  ;;  %v688_v14 = vmax.f32 %v634_v6, 0.0  ;;  %v1192_v15 = vadd.f32 %v1191_v11, %v1190_v3  ;;  %v1240_v16 = vadd.f32 %v1239_v12, %v1238_v4 }
 0x114   : > { %v1121_v17 = vpack.c.bf16 %v776_v7, %v776_v7  ;;  %v1137_v18 = vpack.c.bf16 %v792_v8, %v792_v8  ;;  %v745_v19 = vadd.f32 %v1486_v2, %v708_v9  ;;  %v761_v20 = vadd.f32 %v1486_v2, %v724_v10  ;;  %v1193_v21 = vpop.f32.mrf.mxu0  ;;  %v1241_v22 = vpop.f32.mrf.mxu1 }
 0x115   : > { %v709_v23 = vmul.f32 %v1481_v59, %v672_v13  ;;  %v725_v24 = vmul.f32 %v1481_v59, %v688_v14  ;;  %v573_v25 = vadd.f32 %v1192_v15, %v1474_v50  ;;  %v637_v26 = vadd.f32 %v1240_v16, %v1474_v50 }
 0x116   : > { %937 = vst.msk [vmem:[%s1500_s16 + $0x18] sm:$0xf] %vm930_vm0, %v1121_v17  ;;  %953 = vst.msk [vmem:[%s1500_s16 + $0x58] sm:$0xf] %vm930_vm0, %v1137_v18  ;;  %v777_v27 = vmax.f32 %v745_v19, 0.0  ;;  %v793_v28 = vmax.f32 %v761_v20, 0.0  ;;  %v1194_v29 = vpop.f32.mrf.mxu0  ;;  %v1242_v30 = vpop.f32.mrf.mxu1 }
 0x117   : > { %v746_v31 = vadd.f32 %v1486_v2, %v709_v23  ;;  %v762_v32 = vadd.f32 %v1486_v2, %v725_v24  ;;  %v673_v33 = vmax.f32 %v573_v25, 0.0  ;;  %v689_v34 = vmax.f32 %v637_v26, 0.0 }
 0x118   : > { %v1122_v35 = vpack.c.bf16 %v777_v27, %v777_v27  ;;  %v1138_v36 = vpack.c.bf16 %v793_v28, %v793_v28  ;;  %v1195_v37 = vadd.f32 %v1194_v29, %v1193_v21  ;;  %v1243_v38 = vadd.f32 %v1242_v30, %v1241_v22  ;;  %v1196_v39 = vpop.f32.mrf.mxu0  ;;  %v1244_v40 = vpop.f32.mrf.mxu1 }
 0x119   : > { %v778_v41 = vmax.f32 %v746_v31, 0.0  ;;  %v794_v42 = vmax.f32 %v762_v32, 0.0  ;;  %v710_v43 = vmul.f32 %v1481_v59, %v673_v33  ;;  %v726_v44 = vmul.f32 %v1481_v59, %v689_v34 }
 0x11a   : > { %938 = vst.msk [vmem:[%s1500_s16 + $0x1c] sm:$0xf] %vm930_vm0, %v1122_v35  ;;  %954 = vst.msk [vmem:[%s1500_s16 + $0x5c] sm:$0xf] %vm930_vm0, %v1138_v36  ;;  %v578_v45 = vadd.f32 %v1195_v37, %v1474_v50  ;;  %v642_v46 = vadd.f32 %v1243_v38, %v1474_v50  ;;  %v1197_v47 = vpop.f32.mrf.mxu0  ;;  %v1245_v48 = vpop.f32.mrf.mxu1 }
 0x11b   : > { %v1123_v49 = vpack.c.bf16 %v778_v41, %v778_v41  ;;  %v1139_v51 = vpack.c.bf16 %v794_v42, %v794_v42  ;;  %v747_v52 = vadd.f32 %v1486_v2, %v710_v43  ;;  %v763_v53 = vadd.f32 %v1486_v2, %v726_v44 }
 0x11c   : > { %v674_v54 = vmax.f32 %v578_v45, 0.0  ;;  %v690_v55 = vmax.f32 %v642_v46, 0.0  ;;  %v1198_v56 = vadd.f32 %v1197_v47, %v1196_v39  ;;  %v1246_v57 = vadd.f32 %v1245_v48, %v1244_v40  ;;  %v1199_v58 = vpop.f32.mrf.mxu0  ;;  %v1247_v60 = vpop.f32.mrf.mxu1 }
 0x11d   : > { %939 = vst.msk [vmem:[%s1500_s16 + $0x20] sm:$0xf] %vm930_vm0, %v1123_v49  ;;  %955 = vst.msk [vmem:[%s1500_s16 + $0x60] sm:$0xf] %vm930_vm0, %v1139_v51  ;;  %v779_v61 = vmax.f32 %v747_v52, 0.0  ;;  %v795_v62 = vmax.f32 %v763_v53, 0.0 }
 0x11e   : > { %v711_v63 = vmul.f32 %v1481_v59, %v674_v54  ;;  %v727_v0 = vmul.f32 %v1481_v59, %v690_v55  ;;  %v581_v1 = vadd.f32 %v1198_v56, %v1474_v50  ;;  %v645_v3 = vadd.f32 %v1246_v57, %v1474_v50  ;;  %v1200_v4 = vpop.f32.mrf.mxu0  ;;  %v1248_v5 = vpop.f32.mrf.mxu1 }
 0x11f   : > { %v1124_v6 = vpack.c.bf16 %v779_v61, %v779_v61  ;;  %v1140_v7 = vpack.c.bf16 %v795_v62, %v795_v62  ;;  %v1201_v8 = vadd.f32 %v1200_v4, %v1199_v58  ;;  %v1249_v9 = vadd.f32 %v1248_v5, %v1247_v60 }
 0x120   : > { %v748_v10 = vadd.f32 %v1486_v2, %v711_v63  ;;  %v764_v11 = vadd.f32 %v1486_v2, %v727_v0  ;;  %v675_v12 = vmax.f32 %v581_v1, 0.0  ;;  %v691_v13 = vmax.f32 %v645_v3, 0.0  ;;  %v1202_v14 = vpop.f32.mrf.mxu0  ;;  %v1250_v15 = vpop.f32.mrf.mxu1 }
 0x121   : > { %940 = vst.msk [vmem:[%s1500_s16 + $0x24] sm:$0xf] %vm930_vm0, %v1124_v6  ;;  %956 = vst.msk [vmem:[%s1500_s16 + $0x64] sm:$0xf] %vm930_vm0, %v1140_v7  ;;  %v586_v16 = vadd.f32 %v1201_v8, %v1474_v50  ;;  %v650_v17 = vadd.f32 %v1249_v9, %v1474_v50 }
 0x122   : > { %v780_v18 = vmax.f32 %v748_v10, 0.0  ;;  %v796_v19 = vmax.f32 %v764_v11, 0.0  ;;  %v712_v20 = vmul.f32 %v1481_v59, %v675_v12  ;;  %v728_v21 = vmul.f32 %v1481_v59, %v691_v13  ;;  %v1203_v22 = vpop.f32.mrf.mxu0  ;;  %v1251_v23 = vpop.f32.mrf.mxu1 }
 0x123   : > { %v676_v24 = vmax.f32 %v586_v16, 0.0  ;;  %v692_v25 = vmax.f32 %v650_v17, 0.0  ;;  %v1204_v26 = vadd.f32 %v1203_v22, %v1202_v14  ;;  %v1252_v27 = vadd.f32 %v1251_v23, %v1250_v15 }
 0x124   : > { %v1125_v28 = vpack.c.bf16 %v780_v18, %v780_v18  ;;  %v1141_v29 = vpack.c.bf16 %v796_v19, %v796_v19  ;;  %v749_v30 = vadd.f32 %v1486_v2, %v712_v20  ;;  %v765_v31 = vadd.f32 %v1486_v2, %v728_v21  ;;  %v1205_v32 = vpop.f32.mrf.mxu0  ;;  %v1253_v33 = vpop.f32.mrf.mxu1 }
 0x125   : > { %v713_v34 = vmul.f32 %v1481_v59, %v676_v24  ;;  %v729_v35 = vmul.f32 %v1481_v59, %v692_v25  ;;  %v589_v36 = vadd.f32 %v1204_v26, %v1474_v50  ;;  %v653_v37 = vadd.f32 %v1252_v27, %v1474_v50 }
 0x126   : > { %941 = vst.msk [vmem:[%s1500_s16 + $0x28] sm:$0xf] %vm930_vm0, %v1125_v28  ;;  %957 = vst.msk [vmem:[%s1500_s16 + $0x68] sm:$0xf] %vm930_vm0, %v1141_v29  ;;  %v781_v38 = vmax.f32 %v749_v30, 0.0  ;;  %v797_v39 = vmax.f32 %v765_v31, 0.0  ;;  %v1206_v40 = vpop.f32.mrf.mxu0  ;;  %v1254_v41 = vpop.f32.mrf.mxu1 }
 0x127   : > { %v750_v42 = vadd.f32 %v1486_v2, %v713_v34  ;;  %v766_v43 = vadd.f32 %v1486_v2, %v729_v35  ;;  %v677_v44 = vmax.f32 %v589_v36, 0.0  ;;  %v693_v45 = vmax.f32 %v653_v37, 0.0 }
 0x128   : > { %v1126_v46 = vpack.c.bf16 %v781_v38, %v781_v38  ;;  %v1142_v47 = vpack.c.bf16 %v797_v39, %v797_v39  ;;  %v1207_v48 = vadd.f32 %v1206_v40, %v1205_v32  ;;  %v1255_v49 = vadd.f32 %v1254_v41, %v1253_v33  ;;  %v1208_v51 = vpop.f32.mrf.mxu0  ;;  %v1256_v52 = vpop.f32.mrf.mxu1 }
 0x129   : > { %v782_v53 = vmax.f32 %v750_v42, 0.0  ;;  %v798_v54 = vmax.f32 %v766_v43, 0.0  ;;  %v714_v55 = vmul.f32 %v1481_v59, %v677_v44  ;;  %v730_v56 = vmul.f32 %v1481_v59, %v693_v45 }
 0x12a   : > { %942 = vst.msk [vmem:[%s1500_s16 + $0x2c] sm:$0xf] %vm930_vm0, %v1126_v46  ;;  %958 = vst.msk [vmem:[%s1500_s16 + $0x6c] sm:$0xf] %vm930_vm0, %v1142_v47  ;;  %v594_v57 = vadd.f32 %v1207_v48, %v1474_v50  ;;  %v658_v58 = vadd.f32 %v1255_v49, %v1474_v50  ;;  %v1209_v60 = vpop.f32.mrf.mxu0  ;;  %v1257_v61 = vpop.f32.mrf.mxu1 }
 0x12b   : > { %v1127_v62 = vpack.c.bf16 %v782_v53, %v782_v53  ;;  %v1143_v63 = vpack.c.bf16 %v798_v54, %v798_v54  ;;  %v751_v0 = vadd.f32 %v1486_v2, %v714_v55  ;;  %v767_v1 = vadd.f32 %v1486_v2, %v730_v56 }
 0x12c   : > { %v678_v3 = vmax.f32 %v594_v57, 0.0  ;;  %v694_v4 = vmax.f32 %v658_v58, 0.0  ;;  %v1210_v5 = vadd.f32 %v1209_v60, %v1208_v51  ;;  %v1258_v6 = vadd.f32 %v1257_v61, %v1256_v52 }
 0x12d   : > { %943 = vst.msk [vmem:[%s1500_s16 + $0x30] sm:$0xf] %vm930_vm0, %v1127_v62  ;;  %959 = vst.msk [vmem:[%s1500_s16 + $0x70] sm:$0xf] %vm930_vm0, %v1143_v63  ;;  %v783_v7 = vmax.f32 %v751_v0, 0.0  ;;  %v799_v8 = vmax.f32 %v767_v1, 0.0 }
 0x12e   : > { %v715_v9 = vmul.f32 %v1481_v59, %v678_v3  ;;  %v731_v10 = vmul.f32 %v1481_v59, %v694_v4  ;;  %v597_v11 = vadd.f32 %v1210_v5, %v1474_v50  ;;  %v661_v12 = vadd.f32 %v1258_v6, %v1474_v50 }
 0x12f   : > { %v1128_v13 = vpack.c.bf16 %v783_v7, %v783_v7  ;;  %v1144_v14 = vpack.c.bf16 %v799_v8, %v799_v8 }
 0x130   : > { %v752_v15 = vadd.f32 %v1486_v2, %v715_v9  ;;  %v768_v16 = vadd.f32 %v1486_v2, %v731_v10  ;;  %v679_v17 = vmax.f32 %v597_v11, 0.0  ;;  %v695_v18 = vmax.f32 %v661_v12, 0.0 }
 0x131   : > { %944 = vst.msk [vmem:[%s1500_s16 + $0x34] sm:$0xf] %vm930_vm0, %v1128_v13  ;;  %960 = vst.msk [vmem:[%s1500_s16 + $0x74] sm:$0xf] %vm930_vm0, %v1144_v14 }
 0x132   : > { %v784_v19 = vmax.f32 %v752_v15, 0.0  ;;  %v800_v20 = vmax.f32 %v768_v16, 0.0  ;;  %v716_v50 = vmul.f32 %v1481_v59, %v679_v17  ;;  %v732_v21 = vmul.f32 %v1481_v59, %v695_v18 }
 0x134   : > { %v1129_v22 = vpack.c.bf16 %v784_v19, %v784_v19  ;;  %v1145_v23 = vpack.c.bf16 %v800_v20, %v800_v20  ;;  %v753_v24 = vadd.f32 %v1486_v2, %v716_v50  ;;  %v769_v25 = vadd.f32 %v1486_v2, %v732_v21 }
 0x136   : > { %945 = vst.msk [vmem:[%s1500_s16 + $0x38] sm:$0xf] %vm930_vm0, %v1129_v22  ;;  %961 = vst.msk [vmem:[%s1500_s16 + $0x78] sm:$0xf] %vm930_vm0, %v1145_v23  ;;  %v785_v26 = vmax.f32 %v753_v24, 0.0  ;;  %v801_v27 = vmax.f32 %v769_v25, 0.0 }
 0x138   : > { %v1130_v28 = vpack.c.bf16 %v785_v26, %v785_v26  ;;  %v1146_v29 = vpack.c.bf16 %v801_v27, %v801_v27 }
 0x13a   : > { %946 = vst.msk [vmem:[%s1500_s16 + $0x3c] sm:$0xf] %vm930_vm0, %v1130_v28  ;;  %962 = vst.msk [vmem:[%s1500_s16 + $0x7c] sm:$0xf] %vm930_vm0, %v1146_v29 }
 0x13b PF: > { %s13_s12 = sadd.s32 1, %s1353_s12  }
 0x13c   : > { %p10_p4 = scmp.ge.s32.totalorder %s13_s12, 4  }
 0x13e   :  { %12 = sbr.rel (!%p10_p4) target bundleno = 1 (0x1), region = 62 }

</bundles_post_ra>
